<compile_context>
chip_gen: v5e
topology: v5e:2x2
jax: 0.10.0
libtpu: 0.0.40
codegen_flags: <defaults>
</compile_context>

<pallas_src>
import math

import jax
import jax.numpy as jnp
from jax.experimental import pallas as pl
from jax.experimental.pallas import tpu as pltpu


def _cm2_linreg_kernel(x_ref, w_ref, b_ref, o_ref):
    # x_ref : (TB, H)  first-token features for this batch tile
    # w_ref : (1, H)   fc.weight (single output neuron)
    # b_ref : (1, 1)   fc.bias
    # o_ref : (TB, 1)  logits for this batch tile
    x = jnp.maximum(x_ref[...].astype(jnp.float32), 0.0)   # ReLU
    w = w_ref[...].astype(jnp.float32)                     # (1, H)
    logits = jnp.sum(x * w, axis=-1, keepdims=True)        # (TB, 1) lane reduction
    o_ref[...] = (logits + b_ref[0, 0]).astype(o_ref.dtype)


def _choose_batch_tile(B, tb=None):
    """Pick a batch tile: either the full batch or a multiple of 8 (sublane rule)."""
    cap = 1024 if tb is None else tb
    if cap >= B:
        return B
    tb = (cap // 8) * 8
    if tb < 8:
        return B
    return tb


def cm2_linear_regression(x, fc_weight, fc_bias, *, tb=None):
    """Pallas forward for CM2LinearRegression.

    x: (B, S, H); fc_weight: (1, H); fc_bias: (1,)
    Returns logits (B, 1) = relu(x[:, 0, :]) @ fc_weight.T + fc_bias
    """
    B, S, H = x.shape
    TB = _choose_batch_tile(B, tb)
    grid = (pl.cdiv(B, TB),)

    if H % 128 == 0:
        # Free (metadata-only) reshape: the first H columns of (B, S*H) are
        # exactly x[:, 0, :], so the BlockSpec DMAs only the first-token slice
        # from HBM with a fully lane-dense (multiple-of-128) last dim.
        x2 = x.reshape(B, S * H)
    else:
        # TODO(synk): a (TB, 1, H) block for the first token would violate the
        # (8, 128) tiling constraint when H % 128 != 0, so materialize the
        # first-token slice with XLA instead of fetching it inside the kernel.
        x2 = x[:, 0, :]

    w = fc_weight.astype(jnp.float32)            # (1, H)
    bias2 = fc_bias.reshape(1, 1).astype(jnp.float32)

    cost = pl.CostEstimate(
        flops=3 * B * H,                         # relu + mul + add per element
        transcendentals=0,
        bytes_accessed=4 * (B * H + H + 1 + B),  # x slice read + w + b + logits write
    )

    out = pl.pallas_call(
        _cm2_linreg_kernel,
        out_shape=jax.ShapeDtypeStruct((B, 1), jnp.float32),
        grid_spec=pltpu.PrefetchScalarGridSpec(
            num_scalar_prefetch=0,
            grid=grid,
            in_specs=[
                pl.BlockSpec((TB, H), lambda i: (i, 0)),   # first-token features
                pl.BlockSpec((1, H), lambda i: (0, 0)),    # fc weight (same every step)
                pl.BlockSpec((1, 1), lambda i: (0, 0)),    # fc bias   (same every step)
            ],
            out_specs=pl.BlockSpec((TB, 1), lambda i: (i, 0)),
        ),
        compiler_params=pltpu.CompilerParams(
            dimension_semantics=("parallel",),             # batch tiles are independent
            vmem_limit_bytes=32 * 1024 * 1024,             # safe on v5e/v6e/v7x
        ),
        cost_estimate=cost,
    )(x2, w, bias2)
    return out


def cm2_linear_regression_ref(x, fc_weight, fc_bias):
    # Pure-JAX reference mirroring the torch forward.
    x0 = jnp.maximum(x[:, 0, :].astype(jnp.float32), 0.0)
    return x0 @ fc_weight.astype(jnp.float32).T + fc_bias.astype(jnp.float32)


if __name__ == "__main__":
    key = jax.random.PRNGKey(0)
    k_x, k_w, k_b, k_x2 = jax.random.split(key, 4)

    # Main case: module default hidden_dim=128 (lane-dense fast path).
    B, S, H = 16, 8, 128
    x = jax.random.normal(k_x, (B, S, H), dtype=jnp.float32)
    # nn.Linear default init: uniform(-1/sqrt(H), 1/sqrt(H)) for weight and bias.
    bound = 1.0 / math.sqrt(H)
    fc_weight = jax.random.uniform(k_w, (1, H), jnp.float32, -bound, bound)
    fc_bias = jax.random.uniform(k_b, (1,), jnp.float32, -bound, bound)

    out = cm2_linear_regression(x, fc_weight, fc_bias, tb=8)  # 2 batch tiles -> grid of 2
    out = jax.block_until_ready(out)
    ref = cm2_linear_regression_ref(x, fc_weight, fc_bias)
    assert out.shape == (B, 1)
    assert jnp.allclose(out, ref, atol=1e-5, rtol=1e-5)

    # Small-H fallback path (H not a multiple of 128).
    B2, S2, H2 = 4, 8, 32
    x_small = jax.random.normal(k_x2, (B2, S2, H2), dtype=jnp.float32)
    out2 = cm2_linear_regression(x_small, fc_weight[:, :H2], fc_bias)
    out2 = jax.block_until_ready(out2)
    ref2 = cm2_linear_regression_ref(x_small, fc_weight[:, :H2], fc_bias)
    assert out2.shape == (B2, 1)
    assert jnp.allclose(out2, ref2, atol=1e-5, rtol=1e-5)

    print("KERNEL_OK")
</pallas_src>

<mosaic_0001>
module attributes {stable_mosaic.version = 11 : i64} {
  func.func @_cm2_linreg_kernel(%arg0: i32, %arg1: memref<8x128xf32, #tpu.memory_space<vmem>>, %arg2: memref<1x128xf32, #tpu.memory_space<vmem>>, %arg3: memref<1x1xf32, #tpu.memory_space<vmem>>, %arg4: memref<8x1xf32, #tpu.memory_space<vmem>>) attributes {dimension_semantics = [#tpu.dimension_semantics<parallel>], iteration_bounds = array<i64: 2>, scalar_prefetch = 0 : i64, scratch_operands = 0 : i64, tpu.core_type = #tpu.core_type<tc>, window_params = [{transform_indices = @transform_0, window_bounds = array<i64: 8, 128>}, {pipeline_mode = #tpu.pipeline_mode<synchronous>, transform_indices = @transform_1, window_bounds = array<i64: 1, 128>}, {pipeline_mode = #tpu.pipeline_mode<synchronous>, transform_indices = @transform_2, window_bounds = array<i64: 1, 1>}, {transform_indices = @transform_3, window_bounds = array<i64: 8, 1>}]} {
    %c0 = arith.constant 0 : index
    %c0_0 = arith.constant 0 : index
    %0 = vector.load %arg1[%c0, %c0_0] : memref<8x128xf32, #tpu.memory_space<vmem>>, vector<8x128xf32>
    %cst = arith.constant 0.000000e+00 : f32
    %1 = vector.broadcast %cst : f32 to vector<8x128xf32>
    %2 = arith.maximumf %0, %1 : vector<8x128xf32>
    %c0_1 = arith.constant 0 : index
    %c0_2 = arith.constant 0 : index
    %3 = vector.load %arg2[%c0_1, %c0_2] : memref<1x128xf32, #tpu.memory_space<vmem>>, vector<1x128xf32>
    %4 = vector.broadcast %3 : vector<1x128xf32> to vector<8x128xf32>
    %5 = arith.mulf %2, %4 : vector<8x128xf32>
    %cst_3 = arith.constant dense<0.000000e+00> : vector<8xf32>
    %6 = vector.multi_reduction <add>, %5, %cst_3 [1] : vector<8x128xf32> to vector<8xf32>
    %7 = vector.shape_cast %6 : vector<8xf32> to vector<8x1xf32>
    %c0_4 = arith.constant 0 : index
    %c0_5 = arith.constant 0 : index
    %8 = vector.load %arg3[%c0_4, %c0_5] : memref<1x1xf32, #tpu.memory_space<vmem>>, vector<1x1xf32>
    %9 = vector.extract %8[0, 0] : f32 from vector<1x1xf32>
    %10 = vector.broadcast %9 : f32 to vector<8x1xf32>
    %11 = arith.addf %7, %10 : vector<8x1xf32>
    %c0_6 = arith.constant 0 : index
    %c0_7 = arith.constant 0 : index
    %12 = vector.load %arg4[%c0_6, %c0_7] : memref<8x1xf32, #tpu.memory_space<vmem>>, vector<8x1xf32>
    tpu.vector_store %arg4[%c0_6, %c0_7], %11 {strides = array<i32>} : memref<8x1xf32, #tpu.memory_space<vmem>>, vector<8x1xf32>,
    return
  }
  func.func @transform_0(%arg0: i32) -> (i32, i32) {
    %c0_i32 = arith.constant 0 : i32
    %c0_i32_0 = arith.constant 0 : i32
    return %arg0, %c0_i32 : i32, i32
  }
  func.func @transform_1(%arg0: i32) -> (i32, i32) {
    %c0_i32 = arith.constant 0 : i32
    %c0_i32_0 = arith.constant 0 : i32
    %c0_i32_1 = arith.constant 0 : i32
    return %c0_i32, %c0_i32_0 : i32, i32
  }
  func.func @transform_2(%arg0: i32) -> (i32, i32) {
    %c0_i32 = arith.constant 0 : i32
    %c0_i32_0 = arith.constant 0 : i32
    %c0_i32_1 = arith.constant 0 : i32
    return %c0_i32, %c0_i32_0 : i32, i32
  }
  func.func @transform_3(%arg0: i32) -> (i32, i32) {
    %c0_i32 = arith.constant 0 : i32
    %c0_i32_0 = arith.constant 0 : i32
    return %arg0, %c0_i32 : i32, i32
  }
}

</mosaic_0001>

<bundles_post_ra>
// kernel: tpu_custom_call.1
= control target key start
LH: loop header
LB: loop body
LE: loop exit
PB: predicated region body
PF: predicated region fallthrough
CT: control target
= control target key end

     0   :  { %s511_s0 = inlined_call_operand.hbm [shape: f32[16,1024], index: 0, kind: input, shape index: {}]   ;;  %s512_s1 = inlined_call_operand.vmem [shape: f32[1,128], index: 1, kind: input, shape index: {}]   ;;  %s513_s2 = inlined_call_operand.<no memory space> [shape: f32[1,1], index: 2, kind: input, shape index: {}]   ;;  %s514_s3 = inlined_call_operand.vmem [shape: f32[16,1], index: 3, kind: output, shape index: {}]  }
   0x1   :  { %v8_v0 = vstv %s513_s2 }
   0x2   :  { %9 = vst [vmem:[#allocation2] sm:$0x1] %v8_v0 }
   0x3   :  { %10 = vsyncpa [#allocation4], 0 }
   0x4   :  { %12 = vsyncpa [#allocation4 + $0x1], 0  ;;  %s414_s14 = smov 0   ;;  %s416_s15 = smov 0  }
   0x5   :  { %s418_s16 = smov 0   ;;  %s420_s17 = smov 0  }
   0x6 LB: > { %s433_s2 = sadd.s32 4294967295, %s389_s17   ;;  %s436_s18 = sadd.s32 1, %s389_s17   ;;  %s389_s17 = sphi %s420_s17, %s521_s17   ;;  %s385_s16 = sphi %s418_s16, %s520_s16   ;;  %s381_s15 = sphi %s416_s15, %s519_s15   ;;  %s377_s14 = sphi %s414_s14, %s518_s14  }
   0x7   : > { %s22_s19 = ssub.s32 %s389_s17, %s436_s18  ;;  %s25_s20 = sadd.s32 1, %s385_s16 }
   0x8   : > { %p23_p0 = scmp.eq.s32.totalorder %s22_s19, 0  ;;  %p32_p1 = scmp.ne.s32.totalorder %s385_s16, %s381_s15 }
   0x9   : > { %p33_p2 = scmp.eq.s32.totalorder %s389_s17, 0  ;;  %p38_p3 = scmp.ne.s32.totalorder %s381_s15, %s377_s14 }
   0xa   : > { %s446_s21 = scalar_select %p23_p0, %s385_s16, %s25_s20  }
   0xb   : > { %p448_p4 = por %p33_p2, %p32_p1  ;;  %p39_p5 = scmp.eq.s32.totalorder %s433_s2, 0 }
   0xc   : > { %p291_p6 = scmp.lt.s32.totalorder %s389_s17, 2  ;;  %s136_s24 = sand.u32 1, %s385_s16  }
   0xd   : > { %p454_p7 = por %p39_p5, %p38_p3  ;;  %s274_s25 = sshll.u32 %s136_s24, 3 }
   0xe   : > { %s282_s26 = sshll.u32 %s389_s17, 6  ;;  %s140_s30 = scalar_lea.vmem [#allocation3], %s274_s25 }
   0xf   : > { %s145_s29 = scalar_lea.hbm %s511_s0, %s282_s26  ;;  %s149_s4 = sshll.u32 %s140_s30, 4  ;;  %s150_s4 = int_to_ptr.vmem [resolvable:$true] %s149_s4 }
  0x10   : > { %s147_s5 = sshll.u32 %s145_s29, 4  ;;  %p465_p8 = pnand %p291_p6, %p448_p4  ;;  %s148_s5 = int_to_ptr.hbm [resolvable:$true] %s147_s5 }
  0x11   : > { %p277_p9 = scmp.ge.s32.totalorder %s389_s17, 1  ;;  %p154_p10 = scmp.lt.s32.totalorder %s389_s17, 3 }
  0x12   : > { %s137_s7 = scalar_lea.sflag [#allocation4], %s136_s24  ;;  %s325_s8 = sshra.s32 %s148_s5, 4  ;;  %s326_s8 = int_to_ptr.hbm [resolvable:$true] %s325_s8 }
  0x13   : > { %s327_s9 = scalar_lea.hbm %s326_s8, 8  ;;  %p329_p12 = pneg %p465_p8 }
  0x14   : > { %p328_p11 = scmp.ne.s32.totalorder %s326_s8, %s327_s9  ;;  %s332_s12 = scalar_lea.hbm %s511_s0, 128 }
  0x15   : > { %p333_p1 = scmp.lt.s32.totalorder %s326_s8, %s511_s0  ;;  %p334_p2 = scmp.lt.s32.totalorder %s332_s12, %s327_s9 }
  0x16   : > { %p330_p13 = pnand %p329_p12, %p328_p11 }
  0x17   : > { %p335_p3 = por %p334_p2, %p333_p1 }
  0x18   : > { %p331_p0 = pneg %p330_p13 }
  0x1a   : > { %p336_p4 = pnand %p335_p3, %p331_p0 }
  0x1c   : > { %339 = shalt.err (!%p336_p4)
}
  0x1d   : > { %290 = dma.hbm_to_vmem [thread:$0]  (!%p465_p8), %s148_s5, 128, %s150_s4, %s137_s7  }
  0x1e   : > { %p155_p5 = pnand %p277_p9, %p154_p10 }
  0x1f   : > { %s160_s19 = sand.u32 (!%p155_p5), 1, %s381_s15  }
  0x20   : > { %158 = sbr.rel (%p155_p5) target bundleno = 162 (0xa2), region = 32  ;;  %s278_s20 = sshll.u32 (!%p155_p5), %s160_s19, 3 }
  0x21   : > { %s161_s22 = scalar_lea.sflag (!%p155_p5), [#allocation4], %s160_s19  ;;  %s164_s24 = scalar_lea.vmem (!%p155_p5), [#allocation3], %s278_s20 }
  0x25   : > { %372 = dma.done.wait (%p454_p7), %s161_s22, 128  }
  0x26   : > { %374 = vsyncadd (%p454_p7), %s161_s22, 4294967168  ;;  %v191_v1 = vld [vmem:[%s164_s24] sm:$0xff]  ;;  %v324_v2 = vld [vmem:[%s512_s1] ss:$0 sm:$0xff]  ;;  %p187_p6 = scmp.lt.s32.totalorder %s433_s2, 1  ;;  %vm204_vm0 = vcmask 7168  }
  0x27   : > { %v192_v3 = vmax.f32 %v191_v1, 0.0  ;;  %v200_v4 = vld [vmem:[#allocation2] sm:$0x1] }
  0x28   : > { %283 = vpush %v200_v4  ;;  %s523_s2 = smov (!%p187_p6, %s433_s2), 1 }
  0x29   : > { %v197_v5 = vmul.f32 %v324_v2, %v192_v3  ;;  %s279_s27 = sshll.u32 %s523_s2, 3 }
  0x2a   : > { %s190_s29 = scalar_lea.vmem %s514_s3, %s279_s27 }
  0x2b   : > { %198 = vadd.xlane.f32.xlu0 %v197_v5 }
  0x59   : > { %s284_s17 = spop %283 }
  0x5a   : > { %v202_v6 = vstv %s284_s17 }
  0x9e   : > { %v199_v7 = vpop.xlane.xlu0 %198 }
  0x9f   : > { %v203_v8 = vadd.f32 %v202_v6, %v199_v7 }
  0xa1   : > { %205 = vst.msk [vmem:[%s190_s29] sm:$0xff] %vm204_vm0, %v203_v8 }
  0xa2 PF: > { %p15_p7 = scmp.ge.s32.totalorder %s436_s18, 4   ;;  %s518_s14 = smov %s381_s15 }
  0xa3   : > { %s519_s15 = smov %s385_s16  ;;  %s520_s16 = smov %s446_s21 }
  0xa4   : > { %s521_s17 = smov %s436_s18  ;;  %17 = sbr.rel (!%p15_p7) target bundleno = 6 (0x6), region = 72 }
  0xa9   :  { %225 = vsyncpa [#allocation4], 1 }
  0xaa   :  { %227 = vsyncpa [#allocation4 + $0x1], 1 }

</bundles_post_ra>
